<compile_context>
chip_gen: v7x
topology: tpu7x:2x2x1
jax: 0.10.0
libtpu: 0.0.40
codegen_flags: <defaults>
</compile_context>

<pallas_src>
import math
import functools

import numpy as np
import jax
import jax.numpy as jnp
from jax import lax
from jax.experimental import pallas as pl
from jax.experimental.pallas import tpu as pltpu


def _apply_activation(x, activation):
    if activation == "relu":
        return jnp.maximum(x, 0.0)
    if activation == "gelu":
        # exact erf-based gelu, matching the reference
        return 0.5 * x * (1.0 + lax.erf(x / math.sqrt(2.0)))
    if activation == "sigmoid":
        return jax.nn.sigmoid(x)
    raise ValueError(f"unknown activation {activation!r}")


def _fused_conv_segment_kernel(*refs, L, N_pad, cins, couts, kernel_sizes,
                               start_pads, activation, mm_dtype):
    """Fused [pad -> Conv1d -> activation] x n_layers, one invocation.

    Ref layout (in order):
      x_ref:    (Cin0, N_pad) f32     lane-dense input slab (column = b*L + l)
      lpos_ref: (1, N_pad) int32      l (position in sequence) per lane; sentinel on pad lanes
      w_ref_i, b_ref_i: (Cout_i, k_i*Cin_i) mm_dtype, (Cout_i, 1) f32   per layer
      o_ref:    (Cout_last, N_pad)
      col_ref:  VMEM scratch (max_i k_i*Cin_i, N_pad) f32   reused im2col slab
      act_ref:  VMEM scratch (max intermediate Cout, N_pad) f32   inter-layer activations
    """
    n_layers = len(kernel_sizes)
    x_ref, lpos_ref = refs[0], refs[1]
    w_refs = refs[2:2 + 2 * n_layers:2]
    b_refs = refs[3:3 + 2 * n_layers:2]
    o_ref = refs[2 + 2 * n_layers]
    col_ref = refs[3 + 2 * n_layers]
    act_ref = refs[4 + 2 * n_layers] if n_layers > 1 else None

    l_pos_row = lpos_ref[...]  # (1, N_pad) int32

    for li in range(n_layers):
        k = kernel_sizes[li]
        sp = start_pads[li]
        cin = cins[li]
        cout = couts[li]
        kc = k * cin

        # Previous layer's activation slab (or the input), full-width load from VMEM.
        prev = x_ref[...] if li == 0 else act_ref[0:cin, :]          # (cin, N_pad) f32
        l_pos = jnp.broadcast_to(l_pos_row, (cin, N_pad))            # hoisted out of tap loop

        # Roll+mask im2col: one full-lane-width (cin, N_pad) store per tap; no zero-fill
        # pass and no per-(batch, tap) masked sub-tile stores.
        for t in range(k):
            d = t - sp                              # source offset: x[l + d]
            shift = (-d) % N_pad                    # np.roll convention: out[n] = in[n + d]
            rolled = prev if shift == 0 else pltpu.roll(prev, shift, 1)
            src_l = l_pos + d
            mask = (src_l >= 0) & (src_l < L)       # kills pad taps, cross-batch and pad lanes
            col_ref[t * cin:(t + 1) * cin, :] = jnp.where(mask, rolled, 0.0)

        # One im2col matmul per layer on the MXU: (cout, k*cin) @ (k*cin, N_pad), f32 acc.
        col = col_ref[0:kc, :].astype(mm_dtype)
        acc = jnp.dot(w_refs[li][...], col, preferred_element_type=jnp.float32)
        acc = acc + b_refs[li][...]                 # (cout, 1) broadcast along lanes
        y = _apply_activation(acc, activation)

        if li == n_layers - 1:
            o_ref[...] = y.astype(o_ref.dtype)      # full-block, lane-dense store
        else:
            act_ref[0:cout, :] = y                  # stays resident in VMEM for next layer


def conv_segment_apply(x, params, activation, kernel_sizes, center_start_pad=False,
                       mm_dtype=jnp.bfloat16):
    """Fused ConvSegment forward.

    x:            (B, Cin, L) float32
    params:       list of (weight (Cout, Cin, k), bias (Cout,)) per conv layer
    kernel_sizes: list of k per conv layer
    mm_dtype:     dtype of the MXU operands (bf16 recommended on v6e/v7x; f32 exact)
    Returns (B, Cout_last, L).
    """
    B, cin0, L = (int(d) for d in x.shape)
    n_layers = len(params)
    BL = B * L
    N_pad = max(128, -(-BL // 128) * 128)   # lane-dense N: >=128 and a multiple of 128

    cins, couts, start_pads, w2ds, b2ds = [], [], [], [], []
    last = cin0
    for i, ((w, b), k) in enumerate(zip(params, kernel_sizes)):
        cout, cin, kk = (int(s) for s in w.shape)
        assert kk == k and cin == last
        cins.append(cin)
        couts.append(cout)
        start_pads.append((k // 2) if (i == 0 and center_start_pad) else 0)
        # Tap-major contraction layout: W2[co, t*cin + ci] = w[co, ci, t]
        w2ds.append(jnp.transpose(w, (0, 2, 1)).reshape(cout, k * cin).astype(mm_dtype))
        b2ds.append(b.reshape(cout, 1).astype(jnp.float32))
        last = cout

    # (B, Cin, L) -> lane-dense (Cin, B*L) slab, zero-padded to N_pad lanes.
    # TODO(synk): at production sizes produce/consume this layout directly instead of the
    # tiny XLA-side relayout here.
    x_flat = jnp.transpose(x, (1, 0, 2)).reshape(cin0, BL).astype(jnp.float32)
    x_flat = jnp.pad(x_flat, ((0, 0), (0, N_pad - BL)))

    # Per-lane position-in-sequence; padded lanes get a large negative sentinel so every
    # tap mask rejects them (no cross-batch / pad-lane leakage).
    lane = np.arange(N_pad)
    lpos_np = np.where(lane < BL, lane % L, -(10 ** 6)).astype(np.int32)
    lpos = jnp.asarray(lpos_np.reshape(1, N_pad))

    kernel = functools.partial(
        _fused_conv_segment_kernel,
        L=L, N_pad=N_pad, cins=tuple(cins), couts=tuple(couts),
        kernel_sizes=tuple(int(k) for k in kernel_sizes),
        start_pads=tuple(start_pads), activation=activation, mm_dtype=mm_dtype,
    )

    flat_inputs = [x_flat, lpos]
    in_specs = [pl.BlockSpec((cin0, N_pad), lambda i: (0, 0)),
                pl.BlockSpec((1, N_pad), lambda i: (0, 0))]
    for w2, b2 in zip(w2ds, b2ds):
        flat_inputs.append(w2)
        in_specs.append(pl.BlockSpec(tuple(w2.shape), lambda i: (0, 0)))
        flat_inputs.append(b2)
        in_specs.append(pl.BlockSpec(tuple(b2.shape), lambda i: (0, 0)))

    # Scratch is region-0 (full lifetime): size the im2col slab by the MAX layer, not the
    # sum, and keep one inter-layer activation slab.
    max_kc = max(int(k) * c for k, c in zip(kernel_sizes, cins))
    scratch_shapes = [pltpu.VMEM((max_kc, N_pad), jnp.float32)]
    if n_layers > 1:
        scratch_shapes.append(pltpu.VMEM((max(couts[:-1]), N_pad), jnp.float32))

    out = pl.pallas_call(
        kernel,
        out_shape=jax.ShapeDtypeStruct((couts[-1], N_pad), x.dtype),
        grid=(1,),
        in_specs=in_specs,
        out_specs=pl.BlockSpec((couts[-1], N_pad), lambda i: (0, 0)),
        scratch_shapes=scratch_shapes,
        compiler_params=pltpu.CompilerParams(
            dimension_semantics=("parallel",)),  # future L-tile axis -> both v7x TCs
    )(*flat_inputs)

    # Drop padded lanes and restore (B, Cout, L); trivial at these sizes.
    # TODO(synk): at production L emit (B, Cout, L) directly from the kernel instead.
    return jnp.transpose(out[:, :BL].reshape(couts[-1], B, L), (1, 0, 2))


def _reference_conv_segment(x, params, activation, kernel_sizes, center_start_pad=False):
    """Pure-JAX reference (mirrors PadLayer -> Conv1d -> activation)."""
    first_conv = True
    for (w, b), k in zip(params, kernel_sizes):
        start_pad = (k // 2) if (first_conv and center_start_pad) else 0
        first_conv = False
        xp = jnp.pad(x, ((0, 0), (0, 0), (start_pad, (k - 1) - start_pad)))
        y = jax.lax.conv_general_dilated(
            xp, w, window_strides=(1,), padding="VALID",
            dimension_numbers=("NCH", "OIH", "NCH"),
        )
        y = y + b.reshape(1, -1, 1)
        x = _apply_activation(y, activation)
    return x


if __name__ == "__main__":
    # Module config: ConvSegment(input_channels=4, activation='gelu',
    #                            kernel_filters_sizes=[(3, 8), (5, 16)])
    B, Cin, L = 2, 4, 16
    kernel_filters_sizes = [(3, 8), (5, 16)]
    activation = "gelu"

    key = jax.random.PRNGKey(0)
    key, xk = jax.random.split(key)
    x = jax.random.normal(xk, (B, Cin, L), dtype=jnp.float32)

    # Deterministic parameter init (Conv1d weight: (out_ch, in_ch, k), bias: (out_ch,))
    params = []
    kernel_sizes = []
    last_out = Cin
    for k_size, f in kernel_filters_sizes:
        key, wk, bk = jax.random.split(key, 3)
        bound = 1.0 / math.sqrt(last_out * k_size)
        w = jax.random.uniform(wk, (f, last_out, k_size), jnp.float32, -bound, bound)
        b = jax.random.uniform(bk, (f,), jnp.float32, -bound, bound)
        params.append((w, b))
        kernel_sizes.append(k_size)
        last_out = f

    # 1) Exact f32 MXU operands: tight check of pad / roll+mask im2col / bias / gelu logic.
    out_f32 = jax.block_until_ready(
        conv_segment_apply(x, params, activation, kernel_sizes,
                           center_start_pad=False, mm_dtype=jnp.float32))
    ref = jax.block_until_ready(
        _reference_conv_segment(x, params, activation, kernel_sizes, False))
    assert out_f32.shape == (B, kernel_filters_sizes[-1][1], L), out_f32.shape
    assert jnp.allclose(out_f32, ref, atol=1e-5, rtol=1e-5), "f32 mismatch vs reference"

    # 1b) center_start_pad=True exercises PadLayer's left-pad (positive shift) path.
    out_c = jax.block_until_ready(
        conv_segment_apply(x, params, activation, kernel_sizes,
                           center_start_pad=True, mm_dtype=jnp.float32))
    ref_c = jax.block_until_ready(
        _reference_conv_segment(x, params, activation, kernel_sizes, True))
    assert jnp.allclose(out_c, ref_c, atol=1e-5, rtol=1e-5), "center_start_pad mismatch"

    # 2) bf16 MXU operands + f32 accumulate: the recommended v6e/v7x fast path
    #    (tolerance relaxed for bf16 rounding, per review).
    out_bf16 = jax.block_until_ready(
        conv_segment_apply(x, params, activation, kernel_sizes,
                           center_start_pad=False, mm_dtype=jnp.bfloat16))
    assert jnp.allclose(out_bf16, ref, atol=5e-2, rtol=5e-2), "bf16 mismatch vs reference"

    print("KERNEL_OK")
</pallas_src>

<mosaic_0001>
module attributes {stable_mosaic.version = 11 : i64} {
  func.func @_fused_conv_segment_kernel(%arg0: i32, %arg1: memref<4x128xf32, #tpu.memory_space<vmem>>, %arg2: memref<1x128xi32, #tpu.memory_space<vmem>>, %arg3: memref<8x12xf32, #tpu.memory_space<vmem>>, %arg4: memref<8x1xf32, #tpu.memory_space<vmem>>, %arg5: memref<16x40xf32, #tpu.memory_space<vmem>>, %arg6: memref<16x1xf32, #tpu.memory_space<vmem>>, %arg7: memref<16x128xf32, #tpu.memory_space<vmem>>, %arg8: memref<40x128xf32, #tpu.memory_space<vmem>>, %arg9: memref<8x128xf32, #tpu.memory_space<vmem>>) attributes {dimension_semantics = [#tpu.dimension_semantics<parallel>], iteration_bounds = array<i64: 1>, scalar_prefetch = 0 : i64, scratch_operands = 2 : i64, tpu.core_type = #tpu.core_type<tc>, window_params = [{pipeline_mode = #tpu.pipeline_mode<synchronous>, transform_indices = @transform_0, window_bounds = array<i64: 4, 128>}, {pipeline_mode = #tpu.pipeline_mode<synchronous>, transform_indices = @transform_1, window_bounds = array<i64: 1, 128>}, {pipeline_mode = #tpu.pipeline_mode<synchronous>, transform_indices = @transform_2, window_bounds = array<i64: 8, 12>}, {pipeline_mode = #tpu.pipeline_mode<synchronous>, transform_indices = @transform_3, window_bounds = array<i64: 8, 1>}, {pipeline_mode = #tpu.pipeline_mode<synchronous>, transform_indices = @transform_4, window_bounds = array<i64: 16, 40>}, {pipeline_mode = #tpu.pipeline_mode<synchronous>, transform_indices = @transform_5, window_bounds = array<i64: 16, 1>}, {pipeline_mode = #tpu.pipeline_mode<synchronous>, transform_indices = @transform_6, window_bounds = array<i64: 16, 128>}]} {
    %c0 = arith.constant 0 : index
    %c0_0 = arith.constant 0 : index
    %0 = vector.load %arg2[%c0, %c0_0] : memref<1x128xi32, #tpu.memory_space<vmem>>, vector<1x128xi32>
    %c0_1 = arith.constant 0 : index
    %c0_2 = arith.constant 0 : index
    %1 = vector.load %arg1[%c0_1, %c0_2] : memref<4x128xf32, #tpu.memory_space<vmem>>, vector<4x128xf32>
    %2 = vector.shape_cast %0 : vector<1x128xi32> to vector<1x128xi32>
    %3 = vector.broadcast %2 : vector<1x128xi32> to vector<4x128xi32>
    %c0_i32 = arith.constant 0 : i32
    %4 = vector.broadcast %c0_i32 : i32 to vector<4x128xi32>
    %5 = arith.addi %3, %4 : vector<4x128xi32>
    %c0_i32_3 = arith.constant 0 : i32
    %6 = vector.broadcast %c0_i32_3 : i32 to vector<4x128xi32>
    %7 = arith.cmpi sge, %5, %6 : vector<4x128xi32>
    %c16_i32 = arith.constant 16 : i32
    %8 = vector.broadcast %c16_i32 : i32 to vector<4x128xi32>
    %9 = arith.cmpi slt, %5, %8 : vector<4x128xi32>
    %10 = arith.andi %7, %9 : vector<4x128xi1>
    %cst = arith.constant 0.000000e+00 : f32
    %11 = vector.broadcast %cst : f32 to vector<4x128xf32>
    %12 = arith.select %10, %1, %11 : vector<4x128xi1>, vector<4x128xf32>
    %c0_4 = arith.constant 0 : index
    %c0_5 = arith.constant 0 : index
    %13 = vector.load %arg8[%c0_4, %c0_5] : memref<40x128xf32, #tpu.memory_space<vmem>>, vector<4x128xf32>
    tpu.vector_store %arg8[%c0_4, %c0_5], %12 {strides = array<i32>} : memref<40x128xf32, #tpu.memory_space<vmem>>, vector<4x128xf32>,
    %c127_i32 = arith.constant 127 : i32
    %14 = tpu.dynamic_rotate %1 by %c127_i32 dim 1 : vector<4x128xf32>, i32 -> vector<4x128xf32>
    %c1_i32 = arith.constant 1 : i32
    %15 = vector.broadcast %c1_i32 : i32 to vector<4x128xi32>
    %16 = arith.addi %3, %15 : vector<4x128xi32>
    %c0_i32_6 = arith.constant 0 : i32
    %17 = vector.broadcast %c0_i32_6 : i32 to vector<4x128xi32>
    %18 = arith.cmpi sge, %16, %17 : vector<4x128xi32>
    %c16_i32_7 = arith.constant 16 : i32
    %19 = vector.broadcast %c16_i32_7 : i32 to vector<4x128xi32>
    %20 = arith.cmpi slt, %16, %19 : vector<4x128xi32>
    %21 = arith.andi %18, %20 : vector<4x128xi1>
    %cst_8 = arith.constant 0.000000e+00 : f32
    %22 = vector.broadcast %cst_8 : f32 to vector<4x128xf32>
    %23 = arith.select %21, %14, %22 : vector<4x128xi1>, vector<4x128xf32>
    %c4 = arith.constant 4 : index
    %c0_9 = arith.constant 0 : index
    %24 = vector.load %arg8[%c4, %c0_9] : memref<40x128xf32, #tpu.memory_space<vmem>>, vector<4x128xf32>
    tpu.vector_store %arg8[%c4, %c0_9], %23 {strides = array<i32>} : memref<40x128xf32, #tpu.memory_space<vmem>>, vector<4x128xf32>,
    %c126_i32 = arith.constant 126 : i32
    %25 = tpu.dynamic_rotate %1 by %c126_i32 dim 1 : vector<4x128xf32>, i32 -> vector<4x128xf32>
    %c2_i32 = arith.constant 2 : i32
    %26 = vector.broadcast %c2_i32 : i32 to vector<4x128xi32>
    %27 = arith.addi %3, %26 : vector<4x128xi32>
    %c0_i32_10 = arith.constant 0 : i32
    %28 = vector.broadcast %c0_i32_10 : i32 to vector<4x128xi32>
    %29 = arith.cmpi sge, %27, %28 : vector<4x128xi32>
    %c16_i32_11 = arith.constant 16 : i32
    %30 = vector.broadcast %c16_i32_11 : i32 to vector<4x128xi32>
    %31 = arith.cmpi slt, %27, %30 : vector<4x128xi32>
    %32 = arith.andi %29, %31 : vector<4x128xi1>
    %cst_12 = arith.constant 0.000000e+00 : f32
    %33 = vector.broadcast %cst_12 : f32 to vector<4x128xf32>
    %34 = arith.select %32, %25, %33 : vector<4x128xi1>, vector<4x128xf32>
    %c8 = arith.constant 8 : index
    %c0_13 = arith.constant 0 : index
    %35 = vector.load %arg8[%c8, %c0_13] : memref<40x128xf32, #tpu.memory_space<vmem>>, vector<4x128xf32>
    tpu.vector_store %arg8[%c8, %c0_13], %34 {strides = array<i32>} : memref<40x128xf32, #tpu.memory_space<vmem>>, vector<4x128xf32>,
    %c0_14 = arith.constant 0 : index
    %c0_15 = arith.constant 0 : index
    %36 = vector.load %arg8[%c0_14, %c0_15] : memref<40x128xf32, #tpu.memory_space<vmem>>, vector<12x128xf32>
    %c0_16 = arith.constant 0 : index
    %c0_17 = arith.constant 0 : index
    %37 = vector.load %arg3[%c0_16, %c0_17] : memref<8x12xf32, #tpu.memory_space<vmem>>, vector<8x12xf32>
    %cst_18 = arith.constant dense<0.000000e+00> : vector<8x128xf32>
    %38 = tpu.matmul %37, %36, %cst_18 {dimension_numbers = #tpu.dot_dimension_numbers<[1], [0], [0], [1], [0, 0, 1, 1], [], []>} : vector<8x12xf32>, vector<12x128xf32>, vector<8x128xf32> -> vector<8x128xf32>
    %c0_19 = arith.constant 0 : index
    %c0_20 = arith.constant 0 : index
    %39 = vector.load %arg4[%c0_19, %c0_20] : memref<8x1xf32, #tpu.memory_space<vmem>>, vector<8x1xf32>
    %40 = vector.broadcast %39 : vector<8x1xf32> to vector<8x128xf32>
    %41 = arith.addf %38, %40 : vector<8x128xf32>
    %cst_21 = arith.constant 5.000000e-01 : f32
    %42 = vector.broadcast %cst_21 : f32 to vector<8x128xf32>
    %43 = arith.mulf %42, %41 : vector<8x128xf32>
    %cst_22 = arith.constant 1.41421354 : f32
    %44 = vector.broadcast %cst_22 : f32 to vector<8x128xf32>
    %45 = arith.divf %41, %44 : vector<8x128xf32>
    %46 = math.erf %45 : vector<8x128xf32>
    %cst_23 = arith.constant 1.000000e+00 : f32
    %47 = vector.broadcast %cst_23 : f32 to vector<8x128xf32>
    %48 = arith.addf %47, %46 : vector<8x128xf32>
    %49 = arith.mulf %43, %48 : vector<8x128xf32>
    %c0_24 = arith.constant 0 : index
    %c0_25 = arith.constant 0 : index
    %50 = vector.load %arg9[%c0_24, %c0_25] : memref<8x128xf32, #tpu.memory_space<vmem>>, vector<8x128xf32>
    tpu.vector_store %arg9[%c0_24, %c0_25], %49 {strides = array<i32>} : memref<8x128xf32, #tpu.memory_space<vmem>>, vector<8x128xf32>,
    %c0_26 = arith.constant 0 : index
    %c0_27 = arith.constant 0 : index
    %51 = vector.load %arg9[%c0_26, %c0_27] : memref<8x128xf32, #tpu.memory_space<vmem>>, vector<8x128xf32>
    %52 = vector.shape_cast %0 : vector<1x128xi32> to vector<1x128xi32>
    %53 = vector.broadcast %52 : vector<1x128xi32> to vector<8x128xi32>
    %c0_i32_28 = arith.constant 0 : i32
    %54 = vector.broadcast %c0_i32_28 : i32 to vector<8x128xi32>
    %55 = arith.addi %53, %54 : vector<8x128xi32>
    %c0_i32_29 = arith.constant 0 : i32
    %56 = vector.broadcast %c0_i32_29 : i32 to vector<8x128xi32>
    %57 = arith.cmpi sge, %55, %56 : vector<8x128xi32>
    %c16_i32_30 = arith.constant 16 : i32
    %58 = vector.broadcast %c16_i32_30 : i32 to vector<8x128xi32>
    %59 = arith.cmpi slt, %55, %58 : vector<8x128xi32>
    %60 = arith.andi %57, %59 : vector<8x128xi1>
    %cst_31 = arith.constant 0.000000e+00 : f32
    %61 = vector.broadcast %cst_31 : f32 to vector<8x128xf32>
    %62 = arith.select %60, %51, %61 : vector<8x128xi1>, vector<8x128xf32>
    %c0_32 = arith.constant 0 : index
    %c0_33 = arith.constant 0 : index
    %63 = vector.load %arg8[%c0_32, %c0_33] : memref<40x128xf32, #tpu.memory_space<vmem>>, vector<8x128xf32>
    tpu.vector_store %arg8[%c0_32, %c0_33], %62 {strides = array<i32>} : memref<40x128xf32, #tpu.memory_space<vmem>>, vector<8x128xf32>,
    %c127_i32_34 = arith.constant 127 : i32
    %64 = tpu.dynamic_rotate %51 by %c127_i32_34 dim 1 : vector<8x128xf32>, i32 -> vector<8x128xf32>
    %c1_i32_35 = arith.constant 1 : i32
    %65 = vector.broadcast %c1_i32_35 : i32 to vector<8x128xi32>
    %66 = arith.addi %53, %65 : vector<8x128xi32>
    %c0_i32_36 = arith.constant 0 : i32
    %67 = vector.broadcast %c0_i32_36 : i32 to vector<8x128xi32>
    %68 = arith.cmpi sge, %66, %67 : vector<8x128xi32>
    %c16_i32_37 = arith.constant 16 : i32
    %69 = vector.broadcast %c16_i32_37 : i32 to vector<8x128xi32>
    %70 = arith.cmpi slt, %66, %69 : vector<8x128xi32>
    %71 = arith.andi %68, %70 : vector<8x128xi1>
    %cst_38 = arith.constant 0.000000e+00 : f32
    %72 = vector.broadcast %cst_38 : f32 to vector<8x128xf32>
    %73 = arith.select %71, %64, %72 : vector<8x128xi1>, vector<8x128xf32>
    %c8_39 = arith.constant 8 : index
    %c0_40 = arith.constant 0 : index
    %74 = vector.load %arg8[%c8_39, %c0_40] : memref<40x128xf32, #tpu.memory_space<vmem>>, vector<8x128xf32>
    tpu.vector_store %arg8[%c8_39, %c0_40], %73 {strides = array<i32>} : memref<40x128xf32, #tpu.memory_space<vmem>>, vector<8x128xf32>,
    %c126_i32_41 = arith.constant 126 : i32
    %75 = tpu.dynamic_rotate %51 by %c126_i32_41 dim 1 : vector<8x128xf32>, i32 -> vector<8x128xf32>
    %c2_i32_42 = arith.constant 2 : i32
    %76 = vector.broadcast %c2_i32_42 : i32 to vector<8x128xi32>
    %77 = arith.addi %53, %76 : vector<8x128xi32>
    %c0_i32_43 = arith.constant 0 : i32
    %78 = vector.broadcast %c0_i32_43 : i32 to vector<8x128xi32>
    %79 = arith.cmpi sge, %77, %78 : vector<8x128xi32>
    %c16_i32_44 = arith.constant 16 : i32
    %80 = vector.broadcast %c16_i32_44 : i32 to vector<8x128xi32>
    %81 = arith.cmpi slt, %77, %80 : vector<8x128xi32>
    %82 = arith.andi %79, %81 : vector<8x128xi1>
    %cst_45 = arith.constant 0.000000e+00 : f32
    %83 = vector.broadcast %cst_45 : f32 to vector<8x128xf32>
    %84 = arith.select %82, %75, %83 : vector<8x128xi1>, vector<8x128xf32>
    %c16 = arith.constant 16 : index
    %c0_46 = arith.constant 0 : index
    %85 = vector.load %arg8[%c16, %c0_46] : memref<40x128xf32, #tpu.memory_space<vmem>>, vector<8x128xf32>
    tpu.vector_store %arg8[%c16, %c0_46], %84 {strides = array<i32>} : memref<40x128xf32, #tpu.memory_space<vmem>>, vector<8x128xf32>,
    %c125_i32 = arith.constant 125 : i32
    %86 = tpu.dynamic_rotate %51 by %c125_i32 dim 1 : vector<8x128xf32>, i32 -> vector<8x128xf32>
    %c3_i32 = arith.constant 3 : i32
    %87 = vector.broadcast %c3_i32 : i32 to vector<8x128xi32>
    %88 = arith.addi %53, %87 : vector<8x128xi32>
    %c0_i32_47 = arith.constant 0 : i32
    %89 = vector.broadcast %c0_i32_47 : i32 to vector<8x128xi32>
    %90 = arith.cmpi sge, %88, %89 : vector<8x128xi32>
    %c16_i32_48 = arith.constant 16 : i32
    %91 = vector.broadcast %c16_i32_48 : i32 to vector<8x128xi32>
    %92 = arith.cmpi slt, %88, %91 : vector<8x128xi32>
    %93 = arith.andi %90, %92 : vector<8x128xi1>
    %cst_49 = arith.constant 0.000000e+00 : f32
    %94 = vector.broadcast %cst_49 : f32 to vector<8x128xf32>
    %95 = arith.select %93, %86, %94 : vector<8x128xi1>, vector<8x128xf32>
    %c24 = arith.constant 24 : index
    %c0_50 = arith.constant 0 : index
    %96 = vector.load %arg8[%c24, %c0_50] : memref<40x128xf32, #tpu.memory_space<vmem>>, vector<8x128xf32>
    tpu.vector_store %arg8[%c24, %c0_50], %95 {strides = array<i32>} : memref<40x128xf32, #tpu.memory_space<vmem>>, vector<8x128xf32>,
    %c124_i32 = arith.constant 124 : i32
    %97 = tpu.dynamic_rotate %51 by %c124_i32 dim 1 : vector<8x128xf32>, i32 -> vector<8x128xf32>
    %c4_i32 = arith.constant 4 : i32
    %98 = vector.broadcast %c4_i32 : i32 to vector<8x128xi32>
    %99 = arith.addi %53, %98 : vector<8x128xi32>
    %c0_i32_51 = arith.constant 0 : i32
    %100 = vector.broadcast %c0_i32_51 : i32 to vector<8x128xi32>
    %101 = arith.cmpi sge, %99, %100 : vector<8x128xi32>
    %c16_i32_52 = arith.constant 16 : i32
    %102 = vector.broadcast %c16_i32_52 : i32 to vector<8x128xi32>
    %103 = arith.cmpi slt, %99, %102 : vector<8x128xi32>
    %104 = arith.andi %101, %103 : vector<8x128xi1>
    %cst_53 = arith.constant 0.000000e+00 : f32
    %105 = vector.broadcast %cst_53 : f32 to vector<8x128xf32>
    %106 = arith.select %104, %97, %105 : vector<8x128xi1>, vector<8x128xf32>
    %c32 = arith.constant 32 : index
    %c0_54 = arith.constant 0 : index
    %107 = vector.load %arg8[%c32, %c0_54] : memref<40x128xf32, #tpu.memory_space<vmem>>, vector<8x128xf32>
    tpu.vector_store %arg8[%c32, %c0_54], %106 {strides = array<i32>} : memref<40x128xf32, #tpu.memory_space<vmem>>, vector<8x128xf32>,
    %c0_55 = arith.constant 0 : index
    %c0_56 = arith.constant 0 : index
    %108 = vector.load %arg8[%c0_55, %c0_56] : memref<40x128xf32, #tpu.memory_space<vmem>>, vector<40x128xf32>
    %c0_57 = arith.constant 0 : index
    %c0_58 = arith.constant 0 : index
    %109 = vector.load %arg5[%c0_57, %c0_58] : memref<16x40xf32, #tpu.memory_space<vmem>>, vector<16x40xf32>
    %cst_59 = arith.constant dense<0.000000e+00> : vector<16x128xf32>
    %110 = tpu.matmul %109, %108, %cst_59 {dimension_numbers = #tpu.dot_dimension_numbers<[1], [0], [0], [1], [0, 0, 1, 1], [], []>} : vector<16x40xf32>, vector<40x128xf32>, vector<16x128xf32> -> vector<16x128xf32>
    %c0_60 = arith.constant 0 : index
    %c0_61 = arith.constant 0 : index
    %111 = vector.load %arg6[%c0_60, %c0_61] : memref<16x1xf32, #tpu.memory_space<vmem>>, vector<16x1xf32>
    %112 = vector.broadcast %111 : vector<16x1xf32> to vector<16x128xf32>
    %113 = arith.addf %110, %112 : vector<16x128xf32>
    %cst_62 = arith.constant 5.000000e-01 : f32
    %114 = vector.broadcast %cst_62 : f32 to vector<16x128xf32>
    %115 = arith.mulf %114, %113 : vector<16x128xf32>
    %cst_63 = arith.constant 1.41421354 : f32
    %116 = vector.broadcast %cst_63 : f32 to vector<16x128xf32>
    %117 = arith.divf %113, %116 : vector<16x128xf32>
    %118 = math.erf %117 : vector<16x128xf32>
    %cst_64 = arith.constant 1.000000e+00 : f32
    %119 = vector.broadcast %cst_64 : f32 to vector<16x128xf32>
    %120 = arith.addf %119, %118 : vector<16x128xf32>
    %121 = arith.mulf %115, %120 : vector<16x128xf32>
    %c0_65 = arith.constant 0 : index
    %c0_66 = arith.constant 0 : index
    %122 = vector.load %arg7[%c0_65, %c0_66] : memref<16x128xf32, #tpu.memory_space<vmem>>, vector<16x128xf32>
    tpu.vector_store %arg7[%c0_65, %c0_66], %121 {strides = array<i32>} : memref<16x128xf32, #tpu.memory_space<vmem>>, vector<16x128xf32>,
    return
  }
  func.func @transform_0(%arg0: i32) -> (i32, i32) {
    %c0_i32 = arith.constant 0 : i32
    %c0_i32_0 = arith.constant 0 : i32
    %c0_i32_1 = arith.constant 0 : i32
    return %c0_i32, %c0_i32_0 : i32, i32
  }
  func.func @transform_1(%arg0: i32) -> (i32, i32) {
    %c0_i32 = arith.constant 0 : i32
    %c0_i32_0 = arith.constant 0 : i32
    %c0_i32_1 = arith.constant 0 : i32
    return %c0_i32, %c0_i32_0 : i32, i32
  }
  func.func @transform_2(%arg0: i32) -> (i32, i32) {
    %c0_i32 = arith.constant 0 : i32
    %c0_i32_0 = arith.constant 0 : i32
    %c0_i32_1 = arith.constant 0 : i32
    return %c0_i32, %c0_i32_0 : i32, i32
  }
  func.func @transform_3(%arg0: i32) -> (i32, i32) {
    %c0_i32 = arith.constant 0 : i32
    %c0_i32_0 = arith.constant 0 : i32
    %c0_i32_1 = arith.constant 0 : i32
    return %c0_i32, %c0_i32_0 : i32, i32
  }
  func.func @transform_4(%arg0: i32) -> (i32, i32) {
    %c0_i32 = arith.constant 0 : i32
    %c0_i32_0 = arith.constant 0 : i32
    %c0_i32_1 = arith.constant 0 : i32
    return %c0_i32, %c0_i32_0 : i32, i32
  }
  func.func @transform_5(%arg0: i32) -> (i32, i32) {
    %c0_i32 = arith.constant 0 : i32
    %c0_i32_0 = arith.constant 0 : i32
    %c0_i32_1 = arith.constant 0 : i32
    return %c0_i32, %c0_i32_0 : i32, i32
  }
  func.func @transform_6(%arg0: i32) -> (i32, i32) {
    %c0_i32 = arith.constant 0 : i32
    %c0_i32_0 = arith.constant 0 : i32
    %c0_i32_1 = arith.constant 0 : i32
    return %c0_i32, %c0_i32_0 : i32, i32
  }
}

</mosaic_0001>

<bundles_post_ra>
// kernel: tpu_custom_call.1
= control target key start
LH: loop header
LB: loop body
LE: loop exit
PB: predicated region body
PF: predicated region fallthrough
CT: control target
= control target key end

     0   :  { %s406_s25 = smov 127   ;;  %s531_s0 = inlined_call_operand.vmem [shape: f32[4,128], index: 0, kind: input, shape index: {}]   ;;  %s532_s1 = inlined_call_operand.vmem [shape: s32[1,128], index: 1, kind: input, shape index: {}]   ;;  %s533_s2 = inlined_call_operand.vmem [shape: f32[8,12], index: 2, kind: input, shape index: {}]   ;;  %s534_s3 = inlined_call_operand.vmem [shape: f32[8,1], index: 3, kind: input, shape index: {}]   ;;  %s535_s4 = inlined_call_operand.vmem [shape: f32[16,40], index: 4, kind: input, shape index: {}]   ;;  %s536_s5 = inlined_call_operand.vmem [shape: f32[16,1], index: 5, kind: input, shape index: {}]   ;;  %s537_s6 = inlined_call_operand.hbm [shape: f32[16,128], index: 6, kind: output, shape index: {}]  }
   0x1   :  { %v25_v0 = vld [vmem:[%s531_s0] sm:$0xf] }
   0x2   :  { %v459_v1 = vld [vmem:[%s532_s1] ss:$0 sm:$0xff]  ;;  %35 = vrot.lane.b32.xlu0 %v25_v0, %s406_s25 }
   0x3   :  { %vm30_vm0 = vcmp.ge.s32.totalorder %v459_v1, 0  ;;  %vm31_vm1 = vcmp.lt.s32.totalorder %v459_v1, 16 }
   0x4   :  { %11 = vsyncpa [#allocation5], 0  ;;  %v407_v4 = vmov 0.0|0.0   ;;  %s408_s0 = smov 126   ;;  %vm409_vm3 = vmmov 0   ;;  %v410_v5 = vmov 0.0  }
   0x5   :  { %vm464_vm2 = vmand %vm30_vm0, %vm31_vm1  ;;  %336 = vmatprep.subr.bf16.mxu0 %v407_v4  ;;  %320 = vmatprep.mubr.msk.f32.mxu0 %vm409_vm3, %v410_v5  ;;  %v54_v6 = vld [vmem:[%s534_s3] sm:$0xff]  ;;  %v411_v7 = vmov 0   ;;  %v37_v8 = vadd.s32 1, %v459_v1  ;;  %v45_v9 = vadd.s32 2, %v459_v1  ;;  %vm64_vm10 = vcmask 1043456   ;;  %s414_s30 = smov 125  }
   0x6   :  { %v33_v3 = vsel %vm464_vm2, %v25_v0, 0.0  ;;  %43 = vrot.lane.b32.xlu0 %v25_v0, %s408_s0  ;;  %360 = vset.pattern.permute.xlu1 %v411_v7  ;;  %vm412_vm11 = vmmov 1   ;;  %v53_v19 = vld [vmem:[%s533_s2] sm:$0xff]  ;;  %vm60_vm13 = vcmask 97280   ;;  %vm191_vm14 = vcmask 326656   ;;  %s413_s2 = smov 124  }
   0x7   :  { %34 = vst [vmem:[#allocation2] sm:$0xf] %v33_v3  ;;  %361 = vset.pattern.permute.xlu0 %v411_v7  ;;  %57 = vperm.xlu1 %360, %v54_v6   ;;  %vm38_vm4 = vcmp.ge.s32.totalorder %v37_v8, 0  ;;  %vm39_vm5 = vcmp.lt.s32.totalorder %v37_v8, 16  ;;  %vm46_vm7 = vcmp.ge.s32.totalorder %v45_v9, 0  ;;  %vm47_vm8 = vcmp.lt.s32.totalorder %v45_v9, 16  ;;  %vm338_vm12 = vmpackc.low %vm64_vm10, %vm412_vm11 }
   0x8   :  { %vm476_vm6 = vmand %vm38_vm4, %vm39_vm5  ;;  %v177_v28 = vld [vmem:[%s535_s4] sm:$0xff]  ;;  %v180_v32 = vld [vmem:[%s536_s5 + $0x8] sm:$0xff]  ;;  %v166_v33 = vadd.s32 4, %v459_v1  ;;  %v158_v34 = vadd.s32 3, %v459_v1  ;;  %s415_s12 = smov [#allocation4]  }
   0x9   :  { %vm482_vm9 = vmand %vm46_vm7, %vm47_vm8  ;;  %333 = vmatprep.mubr.msk.f32.mxu1 %vm191_vm14, %v177_v28  ;;  %v179_v31 = vld [vmem:[%s536_s5] sm:$0xff]  ;;  %v178_v42 = vld [vmem:[%s535_s4 + $0x8] sm:$0xff]  ;;  %s290_s13 = sshll.u32 %s415_s12, 4  ;;  %s291_s13 = int_to_ptr.vmem [resolvable:$true] %s290_s13 }
   0xa   :  { %vm167_vm15 = vcmp.ge.s32.totalorder %v166_v33, 0  ;;  %vm168_vm0 = vcmp.lt.s32.totalorder %v166_v33, 16  ;;  %vm159_vm1 = vcmp.ge.s32.totalorder %v158_v34, 0  ;;  %vm160_vm3 = vcmp.lt.s32.totalorder %v158_v34, 16  ;;  %vm368_vm7 = vmpackc.low %vm476_vm6, %vm464_vm2  ;;  %s382_s4 = scalar_lea.vmem %s291_s13, 256  ;;  %p387_p1 = scmp.lt.s32.totalorder %s291_s13, %s291_s13 }
   0xb   :  { %vm169_vm4 = vmand %vm167_vm15, %vm168_vm0  ;;  %p383_p0 = scmp.ne.s32.totalorder %s291_s13, %s382_s4  ;;  %p388_p2 = scmp.lt.s32.totalorder %s382_s4, %s382_s4 }
   0xc   :  { %vm161_vm5 = vmand %vm159_vm1, %vm160_vm3 }
   0xd   :  { %vm374_vm8 = vmpackc.low %vm161_vm5, %vm482_vm9  ;;  %p389_p3 = por %p388_p2, %p387_p1 }
   0xf   :  { %p390_p4 = pnand %p389_p3, %p383_p0 }
  0x74   :  { %v36_v11 = vpop.permute.xlu0 %35 }
  0x75   :  { %v41_v12 = vsel %vm476_vm6, %v36_v11, 0.0 }
  0x76   :  { %42 = vst [vmem:[#allocation2 + $0x4] sm:$0xf] %v41_v12 }
  0x78   :  { %v44_v14 = vpop.permute.xlu0 %43 }
  0x79   :  { %v49_v15 = vsel %vm482_vm9, %v44_v14, 0.0 }
  0x7a   :  { %50 = vst [vmem:[#allocation2 + $0x8] sm:$0xf] %v49_v15 }
  0x7d   :  { %v51_v16 = vld [vmem:[#allocation2] sm:$0xff] }
  0x81   :  { %v52_v17 = vld [vmem:[#allocation2 + $0x8] sm:$0xf] }
  0x82   :  { %v337_v18 = vpack.c.bf16 %v52_v17, %v51_v16 }
  0x84   :  { %339 = vmatpush3.bf16.msk.msra.mxu0 %vm338_vm12, %v337_v18 }
  0x86   :  { %v58_v20 = vpop.permute.xlu1 %57 }
  0x87   :  { %321 = vmatmul.mubr.msk.f32.vlgmr.msra.gmra.mrb[0].mxu0 %vm60_vm13, %v53_v19 }
 0x15a   :  { %v134_v21 = vpop.f32.mrb[0].mxu0 }
 0x15b   :  { %v135_v22 = vadd.f32 %v134_v21, %v58_v20  ;;  %v322_v23 = vpop.f32.mrb[1].mxu0 }
 0x15d   :  { %v140_v24 = vmul.f32 0.70710677, %v135_v22  ;;  %v138_v26 = vmul.f32 0.5, %v135_v22 }
 0x15f   :  { %362 = verf.f32 %v140_v24 }
 0x169   :  { %v363_v25 = vpop.eup %362 }
 0x16a   :  { %v142_v27 = vadd.f32 1.0, %v363_v25 }
 0x16c   :  { %v143_v29 = vmul.f32 %v142_v27, %v138_v26 }
 0x16e   :  { %v146_v30 = vsel %vm464_vm2, %v143_v29, 0.0  ;;  %152 = vrot.lane.b32.xlu0 %v143_v29, %s408_s0  ;;  %148 = vrot.lane.b32.xlu1 %v143_v29, %s406_s25 }
 0x16f   :  { %147 = vst [vmem:[#allocation2] sm:$0xff] %v146_v30 }
 0x172   :  { %164 = vrot.lane.b32.xlu0 %v143_v29, %s413_s2  ;;  %156 = vrot.lane.b32.xlu1 %v143_v29, %s414_s30 }
 0x176   :  { %183 = vperm.xlu1 %360, %v179_v31   ;;  %188 = vperm.xlu0 %361, %v180_v32  }
 0x1e0   :  { %v153_v35 = vpop.permute.xlu0 %152  ;;  %v149_v36 = vpop.permute.xlu1 %148 }
 0x1e1   :  { %v150_v37 = vsel %vm476_vm6, %v149_v36, 0.0  ;;  %v369_v40 = vpack.c.bf16 %v149_v36, %v143_v29 }
 0x1e2   :  { %151 = vst [vmem:[#allocation2 + $0x8] sm:$0xff] %v150_v37 }
 0x1e3   :  { %370 = vmatprep.subr.msk.bf16.mxu1 %vm368_vm7, %v369_v40 }
 0x1e4   :  { %v165_v38 = vpop.permute.xlu0 %164  ;;  %v157_v39 = vpop.permute.xlu1 %156  ;;  %373 = vmatpush3.bf16.msk.msra.mxu1 %vm368_vm7, %v369_v40 }
 0x1e5   :  { %v375_v41 = vpack.c.bf16 %v157_v39, %v153_v35 }
 0x1e7   :  { %376 = vmatprep.subr.msk.bf16.mxu1 %vm374_vm8, %v375_v41 }
 0x1e8   :  { %379 = vmatpush3.bf16.msk.msra.mxu1 %vm374_vm8, %v375_v41 }
 0x1e9   :  { %380 = vmatprep.subr.msk.mxu1 %vm169_vm4, %v165_v38 }
 0x1ec   :  { %381 = vmatpush3.msk.msra.mxu1 %vm169_vm4, %v165_v38 }
 0x1ed   :  { %334 = vmatmul.mubr.msk.f32.vlgmr.msra.gmra.mrb[0].mxu1 %vm191_vm14, %v178_v42 }
 0x1f5   :  { %v189_v43 = vpop.permute.xlu0 %188  ;;  %v184_v45 = vpop.permute.xlu1 %183 }
 0x2c0   :  { %v335_v44 = vpop.f32.mrb[0].mxu1 }
 0x2c1   :  { %v270_v46 = vadd.f32 %v335_v44, %v189_v43  ;;  %v264_v47 = vpop.f32.mrb[1].mxu1 }
 0x2c2   :  { %v265_v48 = vadd.f32 %v264_v47, %v184_v45 }
 0x2c3   :  { %v276_v49 = vmul.f32 0.70710677, %v270_v46  ;;  %v274_v53 = vmul.f32 0.5, %v270_v46 }
 0x2c4   :  { %v275_v50 = vmul.f32 0.70710677, %v265_v48  ;;  %v273_v55 = vmul.f32 0.5, %v265_v48 }
 0x2c5   :  { %364 = verf.f32 %v276_v49 }
 0x2c6   :  { %366 = verf.f32 %v275_v50 }
 0x2cf   :  { %v365_v51 = vpop.eup %364 }
 0x2d0   :  { %v367_v52 = vpop.eup %366  ;;  %v280_v54 = vadd.f32 1.0, %v365_v51 }
 0x2d1   :  { %v279_v56 = vadd.f32 1.0, %v367_v52 }
 0x2d2   :  { %v282_v57 = vmul.f32 %v280_v54, %v274_v53 }
 0x2d3   :  { %v281_v58 = vmul.f32 %v279_v56, %v273_v55 }
 0x2d4   :  { %284 = vst [vmem:[#allocation4 + $0x8] sm:$0xff] %v282_v57 }
 0x2d5   :  { %283 = vst [vmem:[#allocation4] sm:$0xff] %v281_v58 }
 0x2d6   :  { %393 = shalt.err (!%p390_p4)
}
 0x2d7   :  { %s394_s16 = scalar_lea.hbm %s537_s6, 256 }
 0x2d8   :  { %p395_p5 = scmp.ne.s32.totalorder %s537_s6, %s394_s16  ;;  %p398_p6 = scmp.lt.u32.totalorder %s394_s16, %s537_s6 }
 0x2da   :  { %p400_p7 = pnand %p398_p6, %p395_p5 }
 0x2dc   :  { %403 = shalt.err (!%p400_p7)
}
 0x2dd   :  { %s416_s21 = smov 128   ;;  %s417_s22 = smov 8  }
 0x2de   :  { %296 = dma.vmem_to_hbm [thread:$0]  %s291_s13, 256, %s537_s6, [#allocation5], %s416_s21, %s416_s21, %s417_s22  }
 0x2df   :  { %404 = dma.done.wait [#allocation5], 256  }
 0x2e0   :  { %405 = vsyncadd [#allocation5], 4294967040 }
 0x2e1   :  { %300 = vsyncpa [#allocation5], 1 }

</bundles_post_ra>
